<compile_context>
chip_gen: v6e
topology: v6e:2x2x1
jax: 0.10.0
libtpu: 0.0.40
codegen_flags: <defaults>
</compile_context>

<pallas_src>
import numpy as np
import jax
import jax.numpy as jnp
from jax import lax
from jax.experimental import pallas as pl
from jax.experimental.pallas import tpu as pltpu


def _round_up(x, m):
    return (x + m - 1) // m * m


def _padded_f32_bytes(rows, cols):
    # Physical VMEM footprint of an f32 (rows, cols) buffer under (8, 128) tiling.
    return _round_up(max(rows, 1), 8) * _round_up(max(cols, 1), 128) * 4


# ----------------------------------------------------------------------------------
# Pallas kernel 1: edge weights  w_k = exp(-sum_c (src[c,k] - tgt[c,k])^2)
# Vertex (lane) axis is tiled; channel reduction stays inside one block.
# ----------------------------------------------------------------------------------
def _edge_weight_kernel(src_ref, tgt_ref, out_ref):
    # src_ref, tgt_ref: (1, Cg, TN).  out_ref: (1, 1, TN) f32.
    d = src_ref[...].astype(jnp.float32) - tgt_ref[...].astype(jnp.float32)
    out_ref[...] = jnp.exp(-jnp.sum(d * d, axis=1, keepdims=True))


def edge_weight_pallas(src, tgt, tile_n=8192):
    """src, tgt: (BG, Cg, N) (any float dtype).  Returns (BG, N) f32."""
    BG, Cg, N = src.shape
    TN = N if N <= tile_n else tile_n
    out = pl.pallas_call(
        _edge_weight_kernel,
        out_shape=jax.ShapeDtypeStruct((BG, 1, N), jnp.float32),
        grid=(BG, pl.cdiv(N, TN)),
        in_specs=[
            pl.BlockSpec((1, Cg, TN), lambda i, j: (i, 0, j)),
            pl.BlockSpec((1, Cg, TN), lambda i, j: (i, 0, j)),
        ],
        out_specs=pl.BlockSpec((1, 1, TN), lambda i, j: (i, 0, j)),
        compiler_params=pltpu.CompilerParams(
            dimension_semantics=("parallel", "parallel")),
    )(src, tgt)
    return out[:, 0, :]  # (BG, N)


# ----------------------------------------------------------------------------------
# Pallas kernel 2: tree-filter refine (leaf->root aggregation + root->leaf propagation)
# ----------------------------------------------------------------------------------
def refine_pallas(sorted_parent, x_sorted, edge_w, self_w, C, G):
    """sorted_parent: (B, N) int32 BFS parent positions (parent pos < child pos).
    x_sorted: (B, N, C) f32  BFS-sorted features (channels group-block-major).
    edge_w:   (B, N, G) f32  compact per-group edge weights (BFS-sorted).
    self_w:   (B, N, G) f32  compact per-group self weights (BFS-sorted).
    Returns (B, N, CWp) f32; columns [0:C] hold the filtered features."""
    B, N, _ = x_sorted.shape
    assert C % G == 0
    Cg = C // G
    CW = C + G
    CWp = _round_up(CW, 128)          # lane-dense packed row width (pad is "free")

    def kernel(parent_ref, x_ref, ew_ref, sw_ref, out_ref, wbuf):
        b = pl.program_id(0)

        # ---- seed [x*self_w | self_w | 0-pad] built directly in the output block
        # (the output block doubles as the DP working buffer; no copy, no extra
        # scratch), and compact per-group edge weights expanded across their Cg
        # lanes once per batch into `wbuf`. ----
        out_ref[...] = jnp.zeros((1, N, CWp), jnp.float32)
        wbuf[...] = jnp.zeros((N, CWp), jnp.float32)
        for g in range(G):                               # static, G is small
            swg = sw_ref[0, :, g:g + 1]                  # (N, 1)
            ewg = ew_ref[0, :, g:g + 1]                  # (N, 1)
            out_ref[0, :, g * Cg:(g + 1) * Cg] = (
                x_ref[0, :, g * Cg:(g + 1) * Cg] * swg)  # numerator seed
            out_ref[0, :, C + g:C + g + 1] = swg         # denominator seed
            wbuf[:, g * Cg:(g + 1) * Cg] = jnp.broadcast_to(ewg, (N, Cg))
            wbuf[:, C + g:C + g + 1] = ewg               # pad columns stay 0

        # ---- leaf -> root aggregation: accumulate each vertex row into its parent
        # row in reverse BFS order (parent position is always < child position).
        # Each step is ONE unmasked full-width (1, CWp) load/FMA/store.
        def up_body(i, carry):
            k = N - 1 - i
            p = parent_ref[b, k]
            w = wbuf[pl.ds(k, 1), :]
            out_ref[0, pl.ds(p, 1), :] = (out_ref[0, pl.ds(p, 1), :]
                                          + w * out_ref[0, pl.ds(k, 1), :])
            return carry
        lax.fori_loop(0, N - 1, up_body, 0, unroll=16)   # sweepable (8/16/32)

        # ---- root -> leaf propagation, in place: buf[p] already holds the parent's
        # final value and buf[k] still holds its aggregated value.
        #   buf[k] = (1 - w^2) * up[k] + w * down[p]
        # ((1 - w*w)*a is off the loop-carried chain through buf[p]).
        def dn_body(k, carry):
            p = parent_ref[b, k]
            w = wbuf[pl.ds(k, 1), :]
            a = out_ref[0, pl.ds(k, 1), :]
            out_ref[0, pl.ds(k, 1), :] = ((1.0 - w * w) * a
                                          + w * out_ref[0, pl.ds(p, 1), :])
            return carry
        lax.fori_loop(1, N, dn_body, 0, unroll=16)

        # ---- normalize: numerator channels of group g / denominator column C+g.
        # (approx=False keeps the rtol=1e-3/atol=1e-4 reference check comfortable;
        # this is an O(G) per-batch epilogue, not a per-vertex cost.)
        for g in range(G):
            den = out_ref[0, :, C + g:C + g + 1]
            out_ref[0, :, g * Cg:(g + 1) * Cg] = (
                out_ref[0, :, g * Cg:(g + 1) * Cg] * pl.reciprocal(den, approx=False))

    # -------- chip-aware VMEM budget (count lane-padded footprints exactly) --------
    x_bytes = _padded_f32_bytes(N, C)
    g_bytes = _padded_f32_bytes(N, G)
    row_bytes = _padded_f32_bytes(N, CWp)
    vmem_need = 2 * x_bytes + 4 * g_bytes + 2 * row_bytes + row_bytes
    try:
        vmem_cap = int(pltpu.get_tpu_info().vmem_capacity_bytes)
    except Exception:                                    # pragma: no cover
        vmem_cap = 64 * 2 ** 20
    # keep headroom for compiler scratch / semaphores; never go below the 32 MiB default
    vmem_limit = int(min(max(int(vmem_need * 1.25), 32 * 2 ** 20),
                         int(vmem_cap * 0.85)))

    # Single-buffer the big feature input when blocks are large (the DP is
    # latency-bound, so cross-batch prefetch overlap buys little on v7x's 64 MiB).
    big_blocks = (x_bytes + row_bytes) > (8 * 2 ** 20)
    if big_blocks:
        x_spec = pl.BlockSpec((1, N, C), lambda b, parent: (b, 0, 0),
                              pipeline_mode=pl.Buffered(1))
    else:
        x_spec = pl.BlockSpec((1, N, C), lambda b, parent: (b, 0, 0))

    grid_spec = pltpu.PrefetchScalarGridSpec(
        num_scalar_prefetch=1,                 # sorted_parent -> SMEM
        grid=(B,),
        in_specs=[
            x_spec,                                                 # features
            pl.BlockSpec((1, N, G), lambda b, parent: (b, 0, 0)),   # compact edge_w
            pl.BlockSpec((1, N, G), lambda b, parent: (b, 0, 0)),   # compact self_w
        ],
        out_specs=pl.BlockSpec((1, N, CWp), lambda b, parent: (b, 0, 0)),
        scratch_shapes=[pltpu.VMEM((N, CWp), jnp.float32)],         # expanded weights
    )
    return pl.pallas_call(
        kernel,
        out_shape=jax.ShapeDtypeStruct((B, N, CWp), jnp.float32),
        grid_spec=grid_spec,
        compiler_params=pltpu.CompilerParams(
            dimension_semantics=("parallel",),   # batch across TensorCores (v7x)
            vmem_limit_bytes=vmem_limit,
        ),
    )(sorted_parent.astype(jnp.int32),
      x_sorted.astype(jnp.float32),
      edge_w.astype(jnp.float32),
      self_w.astype(jnp.float32))


# ----------------------------------------------------------------------------------
# Host-side glue: tree construction + BFS (mimics _C.bfs_forward)
# ----------------------------------------------------------------------------------
def build_grid_spanning_tree(H, W):
    """Deterministic spanning tree of the 4-connected HxW grid."""
    edges = []
    for r in range(H):
        for c in range(W):
            v = r * W + c
            if v == 0:
                continue
            u = v - 1 if c > 0 else v - W
            edges.append((u, v))
    return np.asarray(edges, dtype=np.int32)          # (N-1, 2)


def bfs_tree(edge_index, N):
    # TODO(synk): _C.bfs_forward is a sequential graph traversal with no clean Pallas
    # equivalent; done host-side in NumPy (pure index bookkeeping, no tensor math).
    adj = [[] for _ in range(N)]
    for u, v in edge_index:
        adj[int(u)].append(int(v))
        adj[int(v)].append(int(u))
    sorted_index = np.zeros(N, np.int32)
    sorted_parent = np.zeros(N, np.int32)
    parent_vertex = np.zeros(N, np.int32)
    pos = np.zeros(N, np.int32)          # pos[v] = BFS position of vertex v (inverse perm)
    visited = np.zeros(N, bool)
    queue = [0]
    visited[0] = True
    head, cnt = 0, 0
    while head < len(queue):
        u = queue[head]
        head += 1
        sorted_index[cnt] = u
        pos[u] = cnt
        cnt += 1
        for w in adj[u]:
            if not visited[w]:
                visited[w] = True
                parent_vertex[w] = u
                queue.append(w)
    for k in range(N):
        v = sorted_index[k]
        sorted_parent[k] = pos[parent_vertex[v]] if k > 0 else 0
    return sorted_index, sorted_parent, pos


# ----------------------------------------------------------------------------------
# TreeFilter2D forward (groups, mapping_func=exp, distance_func=norm2)
# ----------------------------------------------------------------------------------
def tree_filter2d_forward(feature_in, embed_in, tree, groups=1,
                          guide_in=None, self_dist_in=None):
    B, C, H, W = feature_in.shape
    N = H * W
    G = groups
    tree_np = np.asarray(tree)

    si_list, sp_list, pos_list = [], [], []
    for b in range(B):
        si, sp, pos = bfs_tree(tree_np[b], N)
        si_list.append(si)
        sp_list.append(sp)
        pos_list.append(pos)
    sorted_index = jnp.asarray(np.stack(si_list))      # (B, N) BFS pos -> vertex
    sorted_parent = jnp.asarray(np.stack(sp_list))     # (B, N) parent BFS position
    inv_pos = jnp.asarray(np.stack(pos_list))          # (B, N) vertex -> BFS pos

    def build_edge_weight(fm):
        Cf = fm.shape[1]
        fm = fm.reshape(B, Cf, N)                      # keep native dtype (bf16 OK)
        idx = jnp.broadcast_to(sorted_index[:, None, :], fm.shape)
        fm_src = jnp.take_along_axis(fm, idx, axis=2)
        idx_p = jnp.broadcast_to(sorted_parent[:, None, :], fm.shape)
        fm_tgt = jnp.take_along_axis(fm_src, idx_p, axis=2)
        fm_src = fm_src.reshape(B * G, Cf // G, N)
        fm_tgt = fm_tgt.reshape(B * G, Cf // G, N)
        return edge_weight_pallas(fm_src, fm_tgt)      # (B*G, N), BFS-sorted, f32

    edge_weight = build_edge_weight(embed_in).reshape(B, G, N)

    if self_dist_in is None:
        self_w = jnp.ones((B, G, N), jnp.float32)
    else:
        Cs = self_dist_in.shape[1]
        fm = self_dist_in.reshape(B * G, Cs // G, N)
        sw = edge_weight_pallas(fm, jnp.zeros_like(fm))            # exp(-||fm||^2)
        att = sw.reshape(B, G, N)
        idx = jnp.broadcast_to(sorted_index[:, None, :], att.shape)
        att = jnp.take_along_axis(att, idx, axis=2)                # BFS-sorted
        edge_weight = edge_weight * att
        self_w = att
        # TODO(synk): the denominator can underflow toward 0 on this path; the CUDA
        # kernel divides directly, so no epsilon is added here either.

    if guide_in is not None:
        edge_weight = edge_weight * build_edge_weight(guide_in).reshape(B, G, N)

    # Features gathered into BFS order, channels last (lane axis): (B, N, C).
    x_nc = jnp.transpose(feature_in.reshape(B, C, N).astype(jnp.float32), (0, 2, 1))
    idx_f = jnp.broadcast_to(sorted_index[:, :, None], x_nc.shape)
    x_sorted = jnp.take_along_axis(x_nc, idx_f, axis=1)            # (B, N, C)

    # Compact (B, N, G) weights; lane expansion happens inside the refine kernel.
    edge_w_nc = jnp.transpose(edge_weight, (0, 2, 1))              # (B, N, G)
    self_w_nc = jnp.transpose(self_w, (0, 2, 1))                   # (B, N, G)

    out_packed = refine_pallas(sorted_parent, x_sorted, edge_w_nc, self_w_nc,
                               C=C, G=G)                           # (B, N, CWp)
    out_sorted = out_packed[:, :, :C]                              # drop den/pad cols

    # Un-sort back to original vertex order via the host-computed inverse permutation.
    idx_o = jnp.broadcast_to(inv_pos[:, :, None], out_sorted.shape)
    out = jnp.take_along_axis(out_sorted, idx_o, axis=1)           # (B, N, C)
    out = jnp.transpose(out, (0, 2, 1)).reshape(B, C, H, W)
    return out.astype(feature_in.dtype)


# ----------------------------------------------------------------------------------
# Brute-force NumPy reference (supports groups, no guide / self_dist)
# ----------------------------------------------------------------------------------
def reference_tree_filter(feature_in, embed_in, tree, groups=1):
    B, C, H, W = feature_in.shape
    Ce = embed_in.shape[1]
    N = H * W
    Cg, Ceg = C // groups, Ce // groups
    out = np.zeros((B, C, N), np.float64)
    for b in range(B):
        emb = embed_in[b].reshape(Ce, N).astype(np.float64)
        x = feature_in[b].reshape(C, N).astype(np.float64)
        for g in range(groups):
            eg = emb[g * Ceg:(g + 1) * Ceg]
            adj = [[] for _ in range(N)]
            for (u, v) in tree[b]:
                u, v = int(u), int(v)
                d = eg[:, u] - eg[:, v]
                w = np.exp(-np.sum(d * d))
                adj[u].append((v, w))
                adj[v].append((u, w))
            xg = x[g * Cg:(g + 1) * Cg]
            for i in range(N):
                m = np.zeros(N)
                m[i] = 1.0
                seen = np.zeros(N, bool)
                seen[i] = True
                stack = [i]
                while stack:
                    u = stack.pop()
                    for (v, w) in adj[u]:
                        if not seen[v]:
                            seen[v] = True
                            m[v] = m[u] * w
                            stack.append(v)
                out[b, g * Cg:(g + 1) * Cg, i] = (xg * m[None, :]).sum(axis=1) / m.sum()
    return out.reshape(B, C, H, W)


if __name__ == "__main__":
    key = jax.random.PRNGKey(0)
    k1, k2, k3, k4 = jax.random.split(key, 4)

    # Config 1: groups=1.
    B, C, H, W, Ce = 2, 4, 16, 16, 8
    feature_in = jax.random.normal(k1, (B, C, H, W), dtype=jnp.float32)
    embed_in = 0.3 * jax.random.normal(k2, (B, Ce, H, W), dtype=jnp.float32)
    edges = build_grid_spanning_tree(H, W)
    tree = np.stack([edges] * B)                      # (B, N-1, 2) edge_index input
    out = jax.block_until_ready(
        tree_filter2d_forward(feature_in, embed_in, tree, groups=1))
    ref = reference_tree_filter(np.asarray(feature_in), np.asarray(embed_in),
                                tree, groups=1)
    np.testing.assert_allclose(np.asarray(out), ref, rtol=1e-3, atol=1e-4)

    # Config 2: groups=2 (exercises the in-kernel per-group lane broadcast).
    B2, C2, H2, W2, Ce2 = 1, 4, 12, 12, 8
    feature2 = jax.random.normal(k3, (B2, C2, H2, W2), dtype=jnp.float32)
    embed2 = 0.3 * jax.random.normal(k4, (B2, Ce2, H2, W2), dtype=jnp.float32)
    edges2 = build_grid_spanning_tree(H2, W2)
    tree2 = np.stack([edges2] * B2)
    out2 = jax.block_until_ready(
        tree_filter2d_forward(feature2, embed2, tree2, groups=2))
    ref2 = reference_tree_filter(np.asarray(feature2), np.asarray(embed2),
                                 tree2, groups=2)
    np.testing.assert_allclose(np.asarray(out2), ref2, rtol=1e-3, atol=1e-4)

    print("KERNEL_OK")
</pallas_src>

<mosaic_0001>
module attributes {stable_mosaic.version = 11 : i64} {
  func.func @_edge_weight_kernel(%arg0: i32, %arg1: i32, %arg2: memref<1x8x256xf32, #tpu.memory_space<vmem>>, %arg3: memref<1x8x256xf32, #tpu.memory_space<vmem>>, %arg4: memref<1x1x256xf32, #tpu.memory_space<vmem>>) attributes {dimension_semantics = [#tpu.dimension_semantics<parallel>, #tpu.dimension_semantics<parallel>], iteration_bounds = array<i64: 2, 1>, scalar_prefetch = 0 : i64, scratch_operands = 0 : i64, tpu.core_type = #tpu.core_type<tc>, window_params = [{transform_indices = @transform_0, window_bounds = array<i64: 1, 8, 256>}, {transform_indices = @transform_1, window_bounds = array<i64: 1, 8, 256>}, {transform_indices = @transform_2, window_bounds = array<i64: 1, 1, 256>}]} {
    %c0 = arith.constant 0 : index
    %c0_0 = arith.constant 0 : index
    %c0_1 = arith.constant 0 : index
    %0 = vector.load %arg2[%c0, %c0_0, %c0_1] : memref<1x8x256xf32, #tpu.memory_space<vmem>>, vector<1x8x256xf32>
    %c0_2 = arith.constant 0 : index
    %c0_3 = arith.constant 0 : index
    %c0_4 = arith.constant 0 : index
    %1 = vector.load %arg3[%c0_2, %c0_3, %c0_4] : memref<1x8x256xf32, #tpu.memory_space<vmem>>, vector<1x8x256xf32>
    %2 = arith.subf %0, %1 : vector<1x8x256xf32>
    %3 = arith.mulf %2, %2 : vector<1x8x256xf32>
    %cst = arith.constant dense<0.000000e+00> : vector<1x256xf32>
    %4 = vector.multi_reduction <add>, %3, %cst [1] : vector<1x8x256xf32> to vector<1x256xf32>
    %5 = vector.shape_cast %4 : vector<1x256xf32> to vector<1x1x256xf32>
    %cst_5 = arith.constant 0.000000e+00 : f32
    %6 = vector.broadcast %cst_5 : f32 to vector<1x1x256xf32>
    %7 = arith.subf %6, %5 : vector<1x1x256xf32>
    %8 = math.exp %7 : vector<1x1x256xf32>
    %c0_6 = arith.constant 0 : index
    %c0_7 = arith.constant 0 : index
    %c0_8 = arith.constant 0 : index
    %9 = vector.load %arg4[%c0_6, %c0_7, %c0_8] : memref<1x1x256xf32, #tpu.memory_space<vmem>>, vector<1x1x256xf32>
    tpu.vector_store %arg4[%c0_6, %c0_7, %c0_8], %8 {strides = array<i32>} : memref<1x1x256xf32, #tpu.memory_space<vmem>>, vector<1x1x256xf32>,
    return
  }
  func.func @transform_0(%arg0: i32, %arg1: i32) -> (i32, i32, i32) {
    %c0_i32 = arith.constant 0 : i32
    %c0_i32_0 = arith.constant 0 : i32
    return %arg0, %c0_i32, %arg1 : i32, i32, i32
  }
  func.func @transform_1(%arg0: i32, %arg1: i32) -> (i32, i32, i32) {
    %c0_i32 = arith.constant 0 : i32
    %c0_i32_0 = arith.constant 0 : i32
    return %arg0, %c0_i32, %arg1 : i32, i32, i32
  }
  func.func @transform_2(%arg0: i32, %arg1: i32) -> (i32, i32, i32) {
    %c0_i32 = arith.constant 0 : i32
    %c0_i32_0 = arith.constant 0 : i32
    return %arg0, %c0_i32, %arg1 : i32, i32, i32
  }
}

</mosaic_0001>

<bundles_post_ra>
// kernel: tpu_custom_call.1
= control target key start
LH: loop header
LB: loop body
LE: loop exit
PB: predicated region body
PF: predicated region fallthrough
CT: control target
= control target key end

     0   :  { %7 = vsyncpa [#allocation3], 0  ;;  %s816_s0 = inlined_call_operand.hbm [shape: f32[2,8,256], index: 0, kind: input, shape index: {}]   ;;  %s817_s1 = inlined_call_operand.hbm [shape: f32[2,8,256], index: 1, kind: input, shape index: {}]   ;;  %s818_s2 = inlined_call_operand.hbm [shape: f32[2,1,256], index: 2, kind: output, shape index: {}]  }
   0x1   :  { %9 = vsyncpa [#allocation3 + $0x1], 0 }
   0x2   :  { %10 = vsyncpa [#allocation6], 0 }
   0x3   :  { %12 = vsyncpa [#allocation6 + $0x1], 0 }
   0x4   :  { %13 = vsyncpa [#allocation4], 0 }
   0x5   :  { %15 = vsyncpa [#allocation4 + $0x1], 0  ;;  %s654_s9 = smov 0   ;;  %s656_s10 = smov 0  }
   0x6   :  { %s658_s11 = smov 0   ;;  %s660_s12 = smov 0  }
   0x7   :  { %s662_s13 = smov 0   ;;  %s664_s14 = smov 0  }
   0x8 LB: > { %s399_s15 = sadd.s32 4294967295, %s633_s14   ;;  %s400_s16 = sadd.s32 4294967294, %s633_s14   ;;  %s633_s14 = sphi %s664_s14, %s21_s14   ;;  %s629_s13 = sphi %s662_s13, %s830_s13   ;;  %s625_s12 = sphi %s660_s12, %s829_s12   ;;  %s621_s11 = sphi %s658_s11, %s828_s11   ;;  %s617_s10 = sphi %s656_s10, %s827_s10   ;;  %s613_s9 = sphi %s654_s9, %s826_s9  }
   0x9   : > { %s33_s17 = sadd.s32 1, %s629_s13  ;;  %s42_s18 = sadd.s32 1, %s621_s11 }
   0xa   : > { %p35_p0 = scmp.ge.s32.totalorder %s33_s17, 2  ;;  %p49_p1 = scmp.ne.s32.totalorder %s621_s11, %s617_s10 }
   0xb   : > { %p50_p2 = scmp.eq.s32.totalorder %s633_s14, 0  ;;  %p55_p3 = scmp.ne.s32.totalorder %s617_s10, %s613_s9 }
   0xc   : > { %s832_s17 = smov (%p35_p0, %s33_s17), 0  ;;  %p56_p5 = scmp.eq.s32.totalorder %s399_s15, 0 }
   0xd   : > { %p695_p4 = por %p50_p2, %p49_p1  ;;  %s37_s20 = ssub.s32 %s629_s13, %s832_s17 }
   0xe   : > { %p109_p6 = scmp.eq.s32.totalorder %s399_s15, 1  ;;  %p40_p7 = scmp.eq.s32.totalorder %s37_s20, 0 }
   0xf   : > { %p701_p8 = por %p56_p5, %p55_p3  ;;  %p115_p10 = scmp.eq.s32.totalorder %s400_s16, 1 }
  0x10   : > { %p705_p9 = por %p109_p6, %p49_p1  ;;  %p438_p13 = scmp.lt.s32.totalorder %s633_s14, 2 }
  0x11   : > { %s710_s23 = scalar_select %p40_p7, %s621_s11, %s42_s18  }
  0x12   : > { %p712_p11 = por %p115_p10, %p55_p3  ;;  %s719_s25 = sand.u32 1, %s621_s11  }
  0x13   : > { %s403_s26 = sshll.u32 %s719_s25, 4  ;;  %s418_s27 = sshll.u32 %s629_s13, 8 }
  0x14   : > { %s147_s30 = scalar_lea.hbm %s816_s0, %s418_s27  ;;  %s139_s3 = scalar_lea.vmem [#allocation2], %s403_s26 }
  0x15   : > { %s149_s4 = sshll.u32 %s139_s3, 4  ;;  %p728_p0 = pnand %p438_p13, %p695_p4  ;;  %s150_s4 = int_to_ptr.vmem [resolvable:$true] %s149_s4 }
  0x16   : > { %p409_p1 = scmp.ge.s32.totalorder %s633_s14, 1  ;;  %p175_p2 = scmp.lt.s32.totalorder %s633_s14, 3 }
  0x17   : > { %s136_s6 = scalar_lea.sflag [#allocation3], %s719_s25  ;;  %p495_p3 = pneg %p728_p0 }
  0x18   : > { %s506_s7 = scalar_lea.vmem %s150_s4, 256  ;;  %s635_s8 = smov [#allocation2]  }
  0x19   : > { %p507_p5 = scmp.ne.s32.totalorder %s150_s4, %s506_s7  ;;  %s511_s15 = sshll.u32 %s635_s8, 4  ;;  %s512_s15 = int_to_ptr.vmem [resolvable:$false] %s511_s15 }
  0x1a   : > { %s513_s16 = scalar_lea.vmem %s512_s15, 512  ;;  %p514_p4 = scmp.lt.s32.totalorder %s150_s4, %s512_s15 }
  0x1b   : > { %p509_p6 = pnand %p507_p5, %p495_p3  ;;  %p515_p10 = scmp.lt.s32.totalorder %s513_s16, %s506_s7 }
  0x1d   : > { %p510_p7 = pneg %p509_p6  ;;  %p516_p13 = por %p515_p10, %p514_p4 }
  0x1f   : > { %p517_p12 = pnand %p516_p13, %p510_p7 }
  0x21   : > { %520 = shalt.err (!%p517_p12)
}
  0x22   : > { %430 = dma.hbm_to_vmem [thread:$0]  (!%p728_p0), %s147_s30, 256, %s150_s4, %s136_s6  }
  0x23   : > { %p746_p5 = pnand %p409_p1, %p175_p2  ;;  %s168_s28 = scalar_lea.hbm %s817_s1, %s418_s27 }
  0x24   : > { %s160_s29 = scalar_lea.vmem [#allocation5], %s403_s26  ;;  %s157_s7 = scalar_lea.sflag [#allocation6], %s719_s25 }
  0x25   : > { %s170_s3 = sshll.u32 %s160_s29, 4  ;;  %s636_s30 = smov [#allocation5]   ;;  %s171_s3 = int_to_ptr.vmem [resolvable:$true] %s170_s3 }
  0x26   : > { %s534_s8 = scalar_lea.vmem %s171_s3, 256  ;;  %s539_s4 = sshll.u32 %s636_s30, 4  ;;  %s540_s4 = int_to_ptr.vmem [resolvable:$false] %s539_s4 }
  0x27   : > { %p535_p12 = scmp.ne.s32.totalorder %s171_s3, %s534_s8  ;;  %s541_s6 = scalar_lea.vmem %s540_s4, 512 }
  0x28   : > { %p542_p1 = scmp.lt.s32.totalorder %s171_s3, %s540_s4  ;;  %p543_p2 = scmp.lt.s32.totalorder %s541_s6, %s534_s8 }
  0x29   : > { %p537_p6 = pnand %p535_p12, %p495_p3 }
  0x2a   : > { %p544_p4 = por %p543_p2, %p542_p1 }
  0x2b   : > { %p538_p7 = pneg %p537_p6 }
  0x2d   : > { %p545_p10 = pnand %p544_p4, %p538_p7 }
  0x2f   : > { %548 = shalt.err (!%p545_p10)
}
  0x30   : > { %433 = dma.hbm_to_vmem [thread:$0]  (!%p728_p0), %s168_s28, 256, %s171_s3, %s157_s7  }
  0x31   : > { %179 = sbr.rel (%p746_p5) target bundleno = 113 (0x71), region = 28  ;;  %s762_s25 = sand.u32 (!%p746_p5), 1, %s617_s10  }
  0x32   : > { %s410_s26 = sshll.u32 (!%p746_p5), %s762_s25, 4  ;;  %s182_s27 = scalar_lea.sflag (!%p746_p5), [#allocation3], %s762_s25 }
  0x33   : > { %s185_s15 = scalar_lea.vmem (!%p746_p5), [#allocation2], %s410_s26 }
  0x36   : > { %600 = dma.done.wait (%p701_p8), %s182_s27, 256  }
  0x37   : > { %602 = vsyncadd (%p701_p8), %s182_s27, 4294967040  ;;  %s191_s5 = scalar_lea.sflag [#allocation6], %s762_s25  ;;  %s194_s16 = scalar_lea.vmem [#allocation5], %s410_s26 }
  0x38   : > { %604 = dma.done.wait (%p701_p8), %s191_s5, 256  }
  0x39   : > { %606 = vsyncadd (%p701_p8), %s191_s5, 4294967040  ;;  %v223_v0 = vld [vmem:[%s185_s15] sm:$0xff]  ;;  %v224_v1 = vld [vmem:[%s185_s15 + $0x8] sm:$0xff]  ;;  %v637_v24 = vmov 1966171168   ;;  %v255_v26 = vlaneseq  ;;  %s412_s21 = sshll.u32 %s762_s25, 1 }
  0x3a   : > { %v225_v2 = vld [vmem:[%s194_s16] sm:$0xff]  ;;  %v226_v3 = vld [vmem:[%s194_s16 + $0x8] sm:$0xff]  ;;  %v253_v25 = vunpack.c.l.s4 %v637_v24  ;;  %s219_s18 = scalar_lea.vmem [#allocation7], %s412_s21  ;;  %s420_s20 = sshll.u32 %s625_s12, 5 }
  0x3b   : > { %v227_v4 = vsub.f32 %v223_v0, %v225_v2  ;;  %v228_v5 = vsub.f32 %v224_v1, %v226_v3  ;;  %v256_v28 = vshrl.u32 %v255_v26, 7  ;;  %s289_s19 = sshll.u32 %s219_s18, 4  ;;  %vm269_vm0 = vcmp.lt.s32.totalorder %v255_v26, 256  ;;  %s287_s3 = scalar_lea.hbm %s818_s2, %s420_s20  ;;  %s290_s19 = int_to_ptr.vmem [resolvable:$true] %s289_s19 }
  0x3c   : > { %v254_v27 = vunpack.c.0.s8 %v253_v25  ;;  %s273_s7 = scalar_lea.sflag [#allocation4], %s762_s25  ;;  %s549_s8 = scalar_lea.vmem %s290_s19, 32 }
  0x3d   : > { %v229_v6 = vmul.f32 %v227_v4, %v227_v4  ;;  %v230_v7 = vmul.f32 %v228_v5, %v228_v5  ;;  %p550_p8 = scmp.ne.s32.totalorder %s290_s19, %s549_s8  ;;  %s638_s30 = smov [#allocation7]  }
  0x3e   : > { %v257_v30 = vsub.s32 %v254_v27, %v256_v28  ;;  %s553_s4 = sshll.u32 %s638_s30, 4  ;;  %s554_s4 = int_to_ptr.vmem [resolvable:$false] %s553_s4 }
  0x3f   : > { %v231_v8 = vrot.slane %v229_v6, 4  ;;  %v237_v9 = vrot.slane %v230_v7, 4  ;;  %p551_p0 = pnand %p550_p8, %p705_p9  ;;  %s555_s6 = scalar_lea.vmem %s554_s4, 64 }
  0x40   : > { %p556_p13 = scmp.lt.s32.totalorder %s290_s19, %s554_s4  ;;  %p557_p5 = scmp.lt.s32.totalorder %s555_s6, %s549_s8 }
  0x41   : > { %v232_v10 = vadd.f32 %v231_v8, %v229_v6  ;;  %v238_v11 = vadd.f32 %v237_v9, %v230_v7  ;;  %p552_p3 = pneg %p551_p0 }
  0x42   : > { %p558_p12 = por %p557_p5, %p556_p13 }
  0x43   : > { %v233_v12 = vrot.slane %v232_v10, 2  ;;  %v239_v13 = vrot.slane %v238_v11, 2 }
  0x44   : > { %p559_p6 = pnand %p558_p12, %p552_p3 }
  0x45   : > { %v234_v14 = vadd.f32 %v233_v12, %v232_v10  ;;  %v240_v15 = vadd.f32 %v239_v13, %v238_v11 }
  0x47   : > { %v235_v16 = vrot.slane %v234_v14, 1  ;;  %v241_v17 = vrot.slane %v240_v15, 1 }
  0x49   : > { %v236_v18 = vadd.f32 %v235_v16, %v234_v14  ;;  %v242_v19 = vadd.f32 %v241_v17, %v240_v15 }
  0x4b   : > { %v243_v20 = vsub.f32 0.0, %v236_v18  ;;  %v244_v21 = vsub.f32 0.0, %v242_v19 }
  0x4d   : > { %v245_v22 = vmul.f32 1.442695, %v243_v20  ;;  %v247_v23 = vmul.f32 1.442695, %v244_v21 }
  0x4f   : > { %489 = vpow2.f32 %v245_v22 }
  0x50   : > { %491 = vpow2.f32 %v247_v23 }
  0x5c   : > { %v490_v29 = vpop.eup %489 }
  0x5d   : > { %v492_v31 = vpop.eup %491 }
  0x5e   : > { %v251_v32 = vcombine.low %v490_v29, %v492_v31 }
  0x60   : > { %v258_v33 = vrot.slane %v251_v32, %v257_v30 }
  0x62   : > { %v265_v34 = vrot.slane %v258_v33, %v257_v30 }
  0x64   : > { %271 = vst.msk [vmem:[%s219_s18] sm:$0x3] %vm269_vm0, %v265_v34 }
  0x65   : > { %562 = shalt.err (!%p559_p6)
}
  0x66   : > { %s563_s12 = scalar_lea.hbm %s287_s3, 32  ;;  %s567_s27 = scalar_lea.hbm %s818_s2, 64 }
  0x67   : > { %p564_p7 = scmp.ne.s32.totalorder %s287_s3, %s563_s12  ;;  %p568_p4 = scmp.lt.s32.totalorder %s287_s3, %s818_s2 }
  0x68   : > { %p569_p10 = scmp.lt.s32.totalorder %s567_s27, %s563_s12 }
  0x69   : > { %p565_p1 = pnand %p564_p7, %p705_p9 }
  0x6a   : > { %p570_p8 = por %p569_p10, %p568_p4 }
  0x6b   : > { %p566_p2 = pneg %p565_p1 }
  0x6d   : > { %p571_p0 = pnand %p570_p8, %p566_p2 }
  0x6f   : > { %574 = shalt.err (!%p571_p0)
}
  0x70   : > { %425 = dma.vmem_to_hbm [thread:$0]  (%p705_p9), %s290_s19, 32, %s287_s3, %s273_s7  }
  0x71 PF: > { %s301_s16 = sand.u32 1, %s613_s9   ;;  %p825_p3 = scmp.ge.s32.totalorder %s633_s14, 2 }
  0x72   : > { %s302_s21 = scalar_lea.sflag [#allocation4], %s301_s16 }
  0x73   : > { %p435_p13 = pnand %p825_p3, %p712_p11 }
  0x75   : > { %p436_p5 = pneg %p435_p13 }
  0x77   : > { %608 = dma.done.wait (%p436_p5), %s302_s21, 32  }
  0x78   : > { %610 = vsyncadd (%p436_p5), %s302_s21, 4294967264  ;;  %s21_s14 = sadd.s32 1, %s633_s14   ;;  %s826_s9 = smov %s617_s10 }
  0x79   : > { %p18_p12 = scmp.ge.s32.totalorder %s21_s14, 4   ;;  %s827_s10 = smov %s621_s11 }
  0x7a   : > { %s828_s11 = smov %s710_s23  ;;  %s829_s12 = smov %s629_s13 }
  0x7b   : > { %s830_s13 = smov %s832_s17  ;;  %20 = sbr.rel (!%p18_p12) target bundleno = 8 (0x8), region = 86 }
  0x80   :  { %307 = vsyncpa [#allocation3], 1 }
  0x81   :  { %309 = vsyncpa [#allocation3 + $0x1], 1 }
  0x82   :  { %310 = vsyncpa [#allocation6], 1 }
  0x83   :  { %312 = vsyncpa [#allocation6 + $0x1], 1 }
  0x84   :  { %313 = vsyncpa [#allocation4], 1 }
  0x85   :  { %315 = vsyncpa [#allocation4 + $0x1], 1 }

</bundles_post_ra>
